<compile_context>
chip_gen: v5e
topology: v5e:2x2
jax: 0.10.0
libtpu: 0.0.40
codegen_flags: <defaults>
</compile_context>

<pallas_src>
import math
import functools

import jax
import jax.numpy as jnp
from jax.experimental import pallas as pl
from jax.experimental.pallas import tpu as pltpu


def _round_up(x, m):
    return ((x + m - 1) // m) * m


def _timestep_embed_kernel(t_ref, freqs_ref, w1c_ref, w1s_ref, b1_ref,
                           w2_ref, b2_ref, out_ref):
    """Fused sinusoidal-embedding -> Linear -> SiLU -> Linear for one
    (batch tile i, output-column tile j) grid point."""
    t = t_ref[...].astype(jnp.float32)              # [TB, 1]
    args = t * freqs_ref[...]                       # [TB, half] (broadcast)

    # Embedding ordering is [cos, sin], matching the PyTorch reference
    # (torch.cat([cos(args), sin(args)], dim=-1)).
    cos_e = jnp.cos(args)
    sin_e = jnp.sin(args)

    # Layer 1: split-W1 form of concat([cos, sin]) @ W1 (no lane concat),
    # accumulated in f32 on the MXU.
    h = jnp.dot(cos_e.astype(w1c_ref.dtype), w1c_ref[...],
                preferred_element_type=jnp.float32)
    h = h + jnp.dot(sin_e.astype(w1s_ref.dtype), w1s_ref[...],
                    preferred_element_type=jnp.float32)
    h = h + b1_ref[...]                             # [TB, E_hid] + [1, E_hid]

    # SiLU with the divide routed to the EUP approximate-reciprocal slot
    # (keeps the VALU slot free; ~2^-12 relative error).
    h = h * pl.reciprocal(1.0 + jnp.exp(-h), approx=True)

    # Layer 2 on one column tile of W2.
    out = jnp.dot(h.astype(w2_ref.dtype), w2_ref[...],
                  preferred_element_type=jnp.float32)
    out = out + b2_ref[...]
    out_ref[...] = out.astype(out_ref.dtype)


def prepare_timestep_embedding_params(w1, b1, w2, b2, *, latent_dim,
                                      time_embed_dim, max_period=10000.0,
                                      matmul_dtype=jnp.bfloat16):
    """One-time weight preprocessing, hoisted off the per-step forward path.

    Splits W1 into cos/sin halves, zero-pads hidden/output dims to a
    lane-dense multiple of 128, casts matmul operands to `matmul_dtype`
    (bf16 recommended at real model sizes on v5e/v6e/v7x) and precomputes the
    sinusoidal frequency table.  Weights are stored as [in, out] (y = x@W + b).
    """
    half = latent_dim // 2
    E = time_embed_dim
    E_pad = _round_up(E, 128)

    freqs = jnp.exp(
        -math.log(max_period) * jnp.arange(half, dtype=jnp.float32) / half
    ).reshape(1, half)

    # Split W1 into cos-half / sin-half rows.  For odd latent_dim the reference
    # appends a zero embedding column, so the w1 row at index 2*half multiplies
    # zeros and is dropped.
    w1c = w1[:half]
    w1s = w1[half:2 * half]
    b1p, w2p, b2p = b1, w2, b2
    if E_pad != E:
        w1c = jnp.pad(w1c, ((0, 0), (0, E_pad - E)))
        w1s = jnp.pad(w1s, ((0, 0), (0, E_pad - E)))
        b1p = jnp.pad(b1, (0, E_pad - E))
        w2p = jnp.pad(w2, ((0, E_pad - E), (0, E_pad - E)))
        b2p = jnp.pad(b2, (0, E_pad - E))

    return dict(
        freqs=freqs,
        w1c=jnp.asarray(w1c, matmul_dtype),
        w1s=jnp.asarray(w1s, matmul_dtype),
        b1=jnp.asarray(b1p, jnp.float32).reshape(1, E_pad),   # bias/SiLU in f32
        w2=jnp.asarray(w2p, matmul_dtype),
        b2=jnp.asarray(b2p, jnp.float32).reshape(1, E_pad),
    )


def _default_vmem_limit_bytes():
    # 48 MiB is safe everywhere (v7x has 64 MiB physical VMEM per TC);
    # on v5e/v6e (128 MiB) this raises toward ~100 MiB for larger tiles.
    try:
        cap = int(pltpu.get_tpu_info().vmem_capacity_bytes)
    except Exception:
        cap = 64 * 1024 * 1024
    return int(min(max(cap - 16 * 1024 * 1024, 32 * 1024 * 1024),
                   100 * 1024 * 1024))


@functools.partial(
    jax.jit,
    static_argnames=("time_embed_dim", "tile_b", "tile_n", "out_dtype"))
def timestep_embedding_forward(timesteps, params, *, time_embed_dim,
                               tile_b=256, tile_n=512,
                               out_dtype=jnp.float32):
    """timesteps: [B] (may be fractional).  params: output of
    prepare_timestep_embedding_params.  Returns [B, time_embed_dim] in
    `out_dtype` (pass bf16 if the consumer is bf16 to halve writeback DMA)."""
    freqs, w1c, w1s = params["freqs"], params["w1c"], params["w1s"]
    b1, w2, b2 = params["b1"], params["w2"], params["b2"]

    B = timesteps.shape[0]
    half = freqs.shape[1]
    E_hid = w1c.shape[1]          # padded hidden dim (multiple of 128)
    E_out = w2.shape[1]           # padded output dim (multiple of 128)
    E = time_embed_dim

    # ---- batch tiling (sublane-aligned) ----------------------------------
    B8 = _round_up(B, 8)
    TB = max(8, (min(tile_b, B8) // 8) * 8)
    B_pad = _round_up(B8, TB)
    n_b = B_pad // TB

    # ---- output-column tiling: splits the dominant W2 fetch / layer-2 MXU
    # work across v7x's two TensorCores when the batch axis has one tile. ----
    TN = max(128, (min(tile_n, E_out) // 128) * 128)
    if n_b == 1 and E_out >= 256:
        TN = min(TN, max(128, (E_out // 2) // 128 * 128))
    while E_out % TN:
        TN -= 128
    n_n = E_out // TN

    t2d = timesteps.astype(jnp.float32).reshape(B, 1)
    if B_pad != B:
        t2d = jnp.pad(t2d, ((0, B_pad - B), (0, 0)))

    # Single-buffer the operands whose block never changes across the grid.
    resident = pl.Buffered(1)

    grid_spec = pltpu.PrefetchScalarGridSpec(
        num_scalar_prefetch=0,
        grid=(n_b, n_n),
        in_specs=[
            pl.BlockSpec((TB, 1), lambda i, j: (i, 0)),                         # timesteps
            pl.BlockSpec((1, half), lambda i, j: (0, 0), pipeline_mode=resident),   # freqs
            pl.BlockSpec((half, E_hid), lambda i, j: (0, 0), pipeline_mode=resident),  # W1 cos
            pl.BlockSpec((half, E_hid), lambda i, j: (0, 0), pipeline_mode=resident),  # W1 sin
            pl.BlockSpec((1, E_hid), lambda i, j: (0, 0), pipeline_mode=resident),     # b1
            pl.BlockSpec((E_hid, TN), lambda i, j: (0, j)),                     # W2 col tile
            pl.BlockSpec((1, TN), lambda i, j: (0, j)),                         # b2 col tile
        ],
        out_specs=pl.BlockSpec((TB, TN), lambda i, j: (i, j)),
    )

    w_bytes = (w1c.size + w1s.size + w2.size) * w1c.dtype.itemsize
    cost = pl.CostEstimate(
        flops=int(2 * B_pad * (2 * half * E_hid + E_hid * E_out)),
        transcendentals=int(B_pad * (2 * half + 2 * E_hid * n_n)),
        bytes_accessed=int(w_bytes + (b1.size + b2.size) * 4 + B_pad * 4
                           + B_pad * E_out * jnp.dtype(out_dtype).itemsize),
    )

    out_pad = pl.pallas_call(
        _timestep_embed_kernel,
        out_shape=jax.ShapeDtypeStruct((B_pad, E_out), out_dtype),
        grid_spec=grid_spec,
        compiler_params=pltpu.CompilerParams(
            dimension_semantics=("parallel", "parallel"),
            vmem_limit_bytes=_default_vmem_limit_bytes(),
        ),
        cost_estimate=cost,
    )(t2d, freqs, w1c, w1s, b1, w2, b2)

    # Slice the padding back off (tiny XLA slice outside the kernel).
    return out_pad[:B, :E]


def _reference(timesteps, w1, b1, w2, b2, latent_dim, max_period=10000.0):
    """Plain-JAX reference mirroring the PyTorch module."""
    half = latent_dim // 2
    freqs = jnp.exp(
        -math.log(max_period) * jnp.arange(half, dtype=jnp.float32) / half)
    args = timesteps[:, None].astype(jnp.float32) * freqs[None]
    emb = jnp.concatenate([jnp.cos(args), jnp.sin(args)], axis=-1)
    if latent_dim % 2:
        emb = jnp.concatenate([emb, jnp.zeros_like(emb[:, :1])], axis=-1)
    h = emb @ w1 + b1
    h = h * jax.nn.sigmoid(h)
    return h @ w2 + b2


if __name__ == "__main__":
    B = 8
    LATENT_DIM = 32          # sinusoidal embedding dim (MLP input dim)
    TIME_EMBED_DIM = 32      # MLP hidden/output dim

    key = jax.random.PRNGKey(0)
    k_t, k_w1, k_b1, k_w2, k_b2 = jax.random.split(key, 5)

    # PyTorch Linear-style uniform init bounds.  Weights stored as [in, out]
    # so y = x @ W + b (same semantics as x @ W_pt.T + b).
    lim1 = 1.0 / math.sqrt(LATENT_DIM)
    lim2 = 1.0 / math.sqrt(TIME_EMBED_DIM)
    w1 = jax.random.uniform(k_w1, (LATENT_DIM, TIME_EMBED_DIM),
                            jnp.float32, -lim1, lim1)
    b1 = jax.random.uniform(k_b1, (TIME_EMBED_DIM,), jnp.float32, -lim1, lim1)
    w2 = jax.random.uniform(k_w2, (TIME_EMBED_DIM, TIME_EMBED_DIM),
                            jnp.float32, -lim2, lim2)
    b2 = jax.random.uniform(k_b2, (TIME_EMBED_DIM,), jnp.float32, -lim2, lim2)

    # Fractional timesteps, one per batch element.
    timesteps = jax.random.uniform(k_t, (B,), jnp.float32, 0.0, 1000.0)

    # One-time weight preprocessing (hoisted off the per-step path).
    # f32 operands here keep the toy-size tolerance tight; at real diffusion
    # dims keep the default matmul_dtype=bf16 and validate at the model level.
    params = prepare_timestep_embedding_params(
        w1, b1, w2, b2, latent_dim=LATENT_DIM, time_embed_dim=TIME_EMBED_DIM,
        matmul_dtype=jnp.float32)

    out = timestep_embedding_forward(
        timesteps, params, time_embed_dim=TIME_EMBED_DIM)
    out = jax.block_until_ready(out)

    ref = _reference(timesteps, w1, b1, w2, b2, LATENT_DIM)
    assert out.shape == (B, TIME_EMBED_DIM), out.shape
    # Tolerance accounts for the EUP approximate reciprocal in SiLU (~2^-12).
    assert jnp.allclose(out, ref, atol=2e-3, rtol=2e-3), \
        float(jnp.max(jnp.abs(out - ref)))

    print("KERNEL_OK")
</pallas_src>

<mosaic_0001>
module attributes {stable_mosaic.version = 11 : i64} {
  func.func @_timestep_embed_kernel(%arg0: i32, %arg1: i32, %arg2: memref<8x1xf32, #tpu.memory_space<vmem>>, %arg3: memref<1x16xf32, #tpu.memory_space<vmem>>, %arg4: memref<16x128xf32, #tpu.memory_space<vmem>>, %arg5: memref<16x128xf32, #tpu.memory_space<vmem>>, %arg6: memref<1x128xf32, #tpu.memory_space<vmem>>, %arg7: memref<128x128xf32, #tpu.memory_space<vmem>>, %arg8: memref<1x128xf32, #tpu.memory_space<vmem>>, %arg9: memref<8x128xf32, #tpu.memory_space<vmem>>) attributes {dimension_semantics = [#tpu.dimension_semantics<parallel>, #tpu.dimension_semantics<parallel>], iteration_bounds = array<i64: 1, 1>, scalar_prefetch = 0 : i64, scratch_operands = 0 : i64, tpu.core_type = #tpu.core_type<tc>, window_params = [{transform_indices = @transform_0, window_bounds = array<i64: 8, 1>}, {pipeline_mode = #tpu.pipeline_mode<synchronous>, transform_indices = @transform_1, window_bounds = array<i64: 1, 16>}, {pipeline_mode = #tpu.pipeline_mode<synchronous>, transform_indices = @transform_2, window_bounds = array<i64: 16, 128>}, {pipeline_mode = #tpu.pipeline_mode<synchronous>, transform_indices = @transform_3, window_bounds = array<i64: 16, 128>}, {pipeline_mode = #tpu.pipeline_mode<synchronous>, transform_indices = @transform_4, window_bounds = array<i64: 1, 128>}, {transform_indices = @transform_5, window_bounds = array<i64: 128, 128>}, {transform_indices = @transform_6, window_bounds = array<i64: 1, 128>}, {transform_indices = @transform_7, window_bounds = array<i64: 8, 128>}]} {
    %c0 = arith.constant 0 : index
    %c0_0 = arith.constant 0 : index
    %0 = vector.load %arg2[%c0, %c0_0] : memref<8x1xf32, #tpu.memory_space<vmem>>, vector<8x1xf32>
    %c0_1 = arith.constant 0 : index
    %c0_2 = arith.constant 0 : index
    %1 = vector.load %arg3[%c0_1, %c0_2] : memref<1x16xf32, #tpu.memory_space<vmem>>, vector<1x16xf32>
    %2 = vector.broadcast %0 : vector<8x1xf32> to vector<8x16xf32>
    %3 = vector.broadcast %1 : vector<1x16xf32> to vector<8x16xf32>
    %4 = arith.mulf %2, %3 : vector<8x16xf32>
    %5 = math.cos %4 : vector<8x16xf32>
    %6 = math.sin %4 : vector<8x16xf32>
    %c0_3 = arith.constant 0 : index
    %c0_4 = arith.constant 0 : index
    %7 = vector.load %arg4[%c0_3, %c0_4] : memref<16x128xf32, #tpu.memory_space<vmem>>, vector<16x128xf32>
    %cst = arith.constant dense<0.000000e+00> : vector<8x128xf32>
    %8 = tpu.matmul %5, %7, %cst {dimension_numbers = #tpu.dot_dimension_numbers<[1], [0], [0], [1], [0, 0, 1, 1], [], []>} : vector<8x16xf32>, vector<16x128xf32>, vector<8x128xf32> -> vector<8x128xf32>
    %c0_5 = arith.constant 0 : index
    %c0_6 = arith.constant 0 : index
    %9 = vector.load %arg5[%c0_5, %c0_6] : memref<16x128xf32, #tpu.memory_space<vmem>>, vector<16x128xf32>
    %cst_7 = arith.constant dense<0.000000e+00> : vector<8x128xf32>
    %10 = tpu.matmul %6, %9, %cst_7 {dimension_numbers = #tpu.dot_dimension_numbers<[1], [0], [0], [1], [0, 0, 1, 1], [], []>} : vector<8x16xf32>, vector<16x128xf32>, vector<8x128xf32> -> vector<8x128xf32>
    %11 = arith.addf %8, %10 : vector<8x128xf32>
    %c0_8 = arith.constant 0 : index
    %c0_9 = arith.constant 0 : index
    %12 = vector.load %arg6[%c0_8, %c0_9] : memref<1x128xf32, #tpu.memory_space<vmem>>, vector<1x128xf32>
    %13 = vector.broadcast %12 : vector<1x128xf32> to vector<8x128xf32>
    %14 = arith.addf %11, %13 : vector<8x128xf32>
    %cst_10 = arith.constant 0.000000e+00 : f32
    %15 = vector.broadcast %cst_10 : f32 to vector<8x128xf32>
    %16 = arith.subf %15, %14 : vector<8x128xf32>
    %17 = math.exp %16 : vector<8x128xf32>
    %cst_11 = arith.constant 1.000000e+00 : f32
    %18 = vector.broadcast %cst_11 : f32 to vector<8x128xf32>
    %19 = arith.addf %18, %17 : vector<8x128xf32>
    %20 = tpu.reciprocal %19 {approx = true} : vector<8x128xf32> -> vector<8x128xf32>
    %21 = arith.mulf %14, %20 : vector<8x128xf32>
    %c0_12 = arith.constant 0 : index
    %c0_13 = arith.constant 0 : index
    %22 = vector.load %arg7[%c0_12, %c0_13] : memref<128x128xf32, #tpu.memory_space<vmem>>, vector<128x128xf32>
    %cst_14 = arith.constant dense<0.000000e+00> : vector<8x128xf32>
    %23 = tpu.matmul %21, %22, %cst_14 {dimension_numbers = #tpu.dot_dimension_numbers<[1], [0], [0], [1], [0, 0, 1, 1], [], []>} : vector<8x128xf32>, vector<128x128xf32>, vector<8x128xf32> -> vector<8x128xf32>
    %c0_15 = arith.constant 0 : index
    %c0_16 = arith.constant 0 : index
    %24 = vector.load %arg8[%c0_15, %c0_16] : memref<1x128xf32, #tpu.memory_space<vmem>>, vector<1x128xf32>
    %25 = vector.broadcast %24 : vector<1x128xf32> to vector<8x128xf32>
    %26 = arith.addf %23, %25 : vector<8x128xf32>
    %c0_17 = arith.constant 0 : index
    %c0_18 = arith.constant 0 : index
    %27 = vector.load %arg9[%c0_17, %c0_18] : memref<8x128xf32, #tpu.memory_space<vmem>>, vector<8x128xf32>
    tpu.vector_store %arg9[%c0_17, %c0_18], %26 {strides = array<i32>} : memref<8x128xf32, #tpu.memory_space<vmem>>, vector<8x128xf32>,
    return
  }
  func.func @transform_0(%arg0: i32, %arg1: i32) -> (i32, i32) {
    %c0_i32 = arith.constant 0 : i32
    %c0_i32_0 = arith.constant 0 : i32
    return %arg0, %c0_i32 : i32, i32
  }
  func.func @transform_1(%arg0: i32, %arg1: i32) -> (i32, i32) {
    %c0_i32 = arith.constant 0 : i32
    %c0_i32_0 = arith.constant 0 : i32
    %c0_i32_1 = arith.constant 0 : i32
    return %c0_i32, %c0_i32_0 : i32, i32
  }
  func.func @transform_2(%arg0: i32, %arg1: i32) -> (i32, i32) {
    %c0_i32 = arith.constant 0 : i32
    %c0_i32_0 = arith.constant 0 : i32
    %c0_i32_1 = arith.constant 0 : i32
    return %c0_i32, %c0_i32_0 : i32, i32
  }
  func.func @transform_3(%arg0: i32, %arg1: i32) -> (i32, i32) {
    %c0_i32 = arith.constant 0 : i32
    %c0_i32_0 = arith.constant 0 : i32
    %c0_i32_1 = arith.constant 0 : i32
    return %c0_i32, %c0_i32_0 : i32, i32
  }
  func.func @transform_4(%arg0: i32, %arg1: i32) -> (i32, i32) {
    %c0_i32 = arith.constant 0 : i32
    %c0_i32_0 = arith.constant 0 : i32
    %c0_i32_1 = arith.constant 0 : i32
    return %c0_i32, %c0_i32_0 : i32, i32
  }
  func.func @transform_5(%arg0: i32, %arg1: i32) -> (i32, i32) {
    %c0_i32 = arith.constant 0 : i32
    %c0_i32_0 = arith.constant 0 : i32
    return %c0_i32, %arg1 : i32, i32
  }
  func.func @transform_6(%arg0: i32, %arg1: i32) -> (i32, i32) {
    %c0_i32 = arith.constant 0 : i32
    %c0_i32_0 = arith.constant 0 : i32
    return %c0_i32, %arg1 : i32, i32
  }
  func.func @transform_7(%arg0: i32, %arg1: i32) -> (i32, i32) {
    %c0_i32 = arith.constant 0 : i32
    return %arg0, %arg1 : i32, i32
  }
}

</mosaic_0001>

<bundles_post_ra>
// kernel: timestep_embedding_forward.1
= control target key start
LH: loop header
LB: loop body
LE: loop exit
PB: predicated region body
PF: predicated region fallthrough
CT: control target
= control target key end

     0   :  { %12 = vsyncpa [#allocation3], 0  ;;  %s784_s0 = inlined_call_operand.vmem [shape: f32[8,1], index: 0, kind: input, shape index: {}]   ;;  %s785_s1 = inlined_call_operand.vmem [shape: f32[1,16], index: 1, kind: input, shape index: {}]   ;;  %s786_s2 = inlined_call_operand.hbm [shape: f32[16,128], index: 2, kind: input, shape index: {}]   ;;  %s787_s3 = inlined_call_operand.hbm [shape: f32[16,128], index: 3, kind: input, shape index: {}]   ;;  %s788_s4 = inlined_call_operand.vmem [shape: f32[1,128], index: 4, kind: input, shape index: {}]   ;;  %s789_s5 = inlined_call_operand.hbm [shape: f32[128,128], index: 5, kind: input, shape index: {}]   ;;  %s790_s6 = inlined_call_operand.vmem [shape: f32[1,128], index: 6, kind: input, shape index: {}]   ;;  %s791_s7 = inlined_call_operand.hbm [shape: f32[8,128], index: 7, kind: output, shape index: {}]  }
   0x1   :  { %13 = vsyncpa [#allocation6], 0 }
   0x2   :  { %14 = vsyncpa [#allocation4], 0  ;;  %s36_s26 = sshll.u32 %s787_s3, 4  ;;  %s646_s27 = smov [#allocation5]   ;;  %s37_s26 = int_to_ptr.hbm [resolvable:$true] %s36_s26 }
   0x3   :  { %s38_s28 = sshll.u32 %s646_s27, 4  ;;  %s23_s8 = sshll.u32 %s786_s2, 4  ;;  %s39_s28 = int_to_ptr.vmem [resolvable:$true] %s38_s28  ;;  %s24_s8 = int_to_ptr.hbm [resolvable:$true] %s23_s8 }
   0x4   :  { %s647_s9 = smov 128   ;;  %s648_s10 = smov 8  }
   0x5   :  { %44 = dma.hbm_to_vmem [thread:$0]  %s37_s26, 256, %s39_s28, [#allocation6], %s647_s9, %s647_s9, %s648_s10  }
   0x6   :  { %s649_s11 = smov [#allocation2]   ;;  %s51_s15 = sshll.u32 %s789_s5, 4  ;;  %s52_s15 = int_to_ptr.hbm [resolvable:$true] %s51_s15 }
   0x7   :  { %s25_s12 = sshll.u32 %s649_s11, 4  ;;  %s650_s3 = smov [#allocation7]   ;;  %s26_s12 = int_to_ptr.vmem [resolvable:$true] %s25_s12 }
   0x8   :  { %31 = dma.hbm_to_vmem [thread:$0]  %s24_s8, 256, %s26_s12, [#allocation3], %s647_s9, %s647_s9, %s648_s10  }
   0x9   :  { %s53_s16 = sshll.u32 %s650_s3, 4  ;;  %s54_s16 = int_to_ptr.vmem [resolvable:$true] %s53_s16 }
   0xa   :  { %59 = dma.hbm_to_vmem [thread:$0]  %s52_s15, 2048, %s54_s16, [#allocation6], %s647_s9, %s647_s9, %s648_s10  }
   0xb   :  { %640 = dma.done.wait [#allocation3], 256  }
   0xc   :  { %641 = vsyncadd [#allocation3], 4294967040 }
   0xd   :  { %642 = dma.done.wait [#allocation6], 2304  }
   0xe   :  { %643 = vsyncadd [#allocation6], 4294964992  ;;  %v651_v0 = vmov 0   ;;  %v74_v1 = vld [vmem:[%s784_s0] sm:$0xff]  ;;  %v397_v3 = vld [vmem:[#allocation5 + $0x8] sm:$0xff]  ;;  %s658_s21 = smov [#allocation8]  }
   0xf   :  { %536 = vset.pattern.permute.xlu0 %v651_v0  ;;  %v537_v2 = vld [vmem:[%s785_s1] ss:$0 sm:$0xff]  ;;  %v395_v4 = vld [vmem:[#allocation2 + $0x8] sm:$0xff]  ;;  %v396_v5 = vld [vmem:[#allocation5] sm:$0xff]  ;;  %416 = vmatpush.msra.mxu0 %v397_v3  ;;  %v652_v20 = vmov 683565275  }
  0x10   :  { %78 = vperm.xlu0 %536, %v74_v1   ;;  %439 = vmatpush.msra.mxu1 %v395_v4  ;;  %v394_v7 = vld [vmem:[#allocation2] sm:$0xff]  ;;  %v653_v22 = vmov 2475754826   ;;  %v654_v25 = vmov 2131351028   ;;  %s502_s22 = sshll.u32 %s658_s21, 4  ;;  %s503_s22 = int_to_ptr.vmem [resolvable:$true] %s502_s22 }
  0x11   :  { %417 = vmatpush.msra.mxu0 %v396_v5  ;;  %v655_v28 = vmov 2102212464   ;;  %v656_v31 = vmov 920167782   ;;  %v657_v34 = vmov 1326507024  }
  0x12   :  { %440 = vmatpush.msra.mxu1 %v394_v7  ;;  %s504_s24 = sshll.u32 %s791_s7, 4  ;;  %s505_s24 = int_to_ptr.hbm [resolvable:$true] %s504_s24 }
  0x82   :  { %v79_v6 = vpop.permute.xlu0 %78 }
  0x83   :  { %v715_v8 = vmul.f32 %v537_v2, %v79_v6 }
  0x85   :  { %v88_v9 = vand.u32 2139095040, %v715_v8  ;;  %v85_v12 = vand.u32 2147483647, %v715_v8  ;;  %vm87_vm12 = vcmp.lt.s32.totalorder %v715_v8, 0 }
  0x87   :  { %v89_v10 = vshrl.u32 %v88_v9, 23  ;;  %v92_v14 = vand.u32 8388607, %v85_v12  ;;  %vm86_vm13 = vcmp.le.f32.partialorder %v85_v12, 0.7853982 }
  0x89   :  { %v515_v11 = vadd.s32 4294967169, %v89_v10  ;;  %v93_v18 = vor.u32 8388608, %v92_v14 }
  0x8b   :  { %v95_v13 = vadd.s32 1, %v515_v11  ;;  %v732_v41 = vshll.u32 %v93_v18, 8 }
  0x8d   :  { %vm96_vm0 = vcmp.gt.s32.totalorder %v95_v13, 0  ;;  %v134_v50 = vand.u32 65535, %v732_v41  ;;  %v135_v55 = vshrl.u32 %v732_v41, 16 }
  0x8e   :  { %v97_v15 = vsel %vm96_vm0, %v95_v13, 0 }
  0x8f   :  { %v99_v16 = vand.u32 31, %v97_v15  ;;  %v723_v19 = vshrl.u32 %v97_v15, 5 }
  0x91   :  { %v721_v17 = vsub.s32 32, %v99_v16  ;;  %v102_v21 = vshll.u32 %v652_v20, %v99_v16  ;;  %v105_v23 = vshll.u32 %v653_v22, %v99_v16  ;;  %v108_v27 = vshll.u32 %v654_v25, %v99_v16 }
  0x92   :  { %v111_v30 = vshll.u32 %v655_v28, %v99_v16  ;;  %v114_v33 = vshll.u32 %v656_v31, %v99_v16  ;;  %vm117_vm1 = vcmp.lt.s32.totalorder %v723_v19, 1  ;;  %vm120_vm2 = vcmp.lt.s32.totalorder %v723_v19, 4 }
  0x93   :  { %v103_v24 = vshrl.u32 %v653_v22, %v721_v17  ;;  %v106_v26 = vshrl.u32 %v654_v25, %v721_v17  ;;  %v109_v29 = vshrl.u32 %v655_v28, %v721_v17  ;;  %v112_v32 = vshrl.u32 %v656_v31, %v721_v17 }
  0x94   :  { %v115_v35 = vshrl.u32 %v657_v34, %v721_v17  ;;  %vm119_vm3 = vcmp.lt.s32.totalorder %v723_v19, 3  ;;  %vm118_vm4 = vcmp.lt.s32.totalorder %v723_v19, 2  ;;  %v101_v14 = vshrl.u32 %v652_v20, %v721_v17 }
  0x95   :  { %v104_v36 = vor.u32 %v103_v24, %v102_v21  ;;  %v107_v37 = vor.u32 %v106_v26, %v105_v23  ;;  %v110_v38 = vor.u32 %v109_v29, %v108_v27  ;;  %v113_v39 = vor.u32 %v112_v32, %v111_v30 }
  0x96   :  { %v116_v40 = vor.u32 %v115_v35, %v114_v33 }
  0x97   :  { %v125_v42 = vsel %vm117_vm1, %v104_v36, %v107_v37  ;;  %v129_v43 = vsel %vm117_vm1, %v107_v37, %v110_v38  ;;  %v126_v44 = vsel %vm120_vm2, %v113_v39, 920167782  ;;  %v122_v7 = vsel %vm120_vm2, %v110_v38, 2102212464 }
  0x98   :  { %v130_v45 = vsel %vm120_vm2, %v116_v40, 1326507024  ;;  %v127_v46 = vsel %vm119_vm3, %v110_v38, %v126_v44  ;;  %v121_v24 = vsel %vm117_vm1, %v101_v14, %v104_v36  ;;  %v123_v25 = vsel %vm119_vm3, %v107_v37, %v122_v7 }
  0x99   :  { %v131_v47 = vsel %vm119_vm3, %v113_v39, %v130_v45  ;;  %v128_v48 = vsel %vm118_vm4, %v125_v42, %v127_v46  ;;  %v124_v17 = vsel %vm118_vm4, %v121_v24, %v123_v25 }
  0x9a   :  { %v132_v49 = vsel %vm118_vm4, %v129_v43, %v131_v47  ;;  %v158_v53 = vand.u32 65535, %v128_v48  ;;  %v159_v54 = vshrl.u32 %v128_v48, 16  ;;  %v178_v32 = vmul.u32 %v732_v41, %v124_v17 }
  0x9b   :  { %v136_v51 = vand.u32 65535, %v132_v49  ;;  %v137_v52 = vshrl.u32 %v132_v49, 16  ;;  %vm398_vm4 = vcmask 130048  }
  0x9c   :  { %v161_v57 = vmul.u32 %v159_v54, %v134_v50  ;;  %v162_v59 = vmul.u32 %v158_v53, %v135_v55  ;;  %v160_v62 = vmul.u32 %v158_v53, %v134_v50  ;;  %v163_v2 = vmul.u32 %v159_v54, %v135_v55 }
  0x9d   :  { %v139_v56 = vmul.u32 %v137_v52, %v134_v50  ;;  %v140_v58 = vmul.u32 %v136_v51, %v135_v55  ;;  %v138_v60 = vmul.u32 %v136_v51, %v134_v50  ;;  %v141_v1 = vmul.u32 %v137_v52, %v135_v55  ;;  %v471_v51 = vld [vmem:[#allocation7 + $0x78] sm:$0xff]  ;;  %v470_v52 = vld [vmem:[#allocation7 + $0x70] sm:$0xff] }
  0x9e   :  { %v164_v63 = vshll.u32 %v161_v57, 16  ;;  %v166_v4 = vshll.u32 %v162_v59, 16  ;;  %v165_v22 = vshrl.u32 %v161_v57, 16  ;;  %v167_v28 = vshrl.u32 %v162_v59, 16  ;;  %476 = vmatpush.msra.mxu2 %v471_v51  ;;  %v539_v51 = vld [vmem:[%s790_s6] ss:$0 sm:$0xff] }
  0x9f   :  { %v142_v61 = vshll.u32 %v139_v56, 16  ;;  %v144_v3 = vshll.u32 %v140_v58, 16  ;;  %v143_v18 = vshrl.u32 %v139_v56, 16  ;;  %v145_v26 = vshrl.u32 %v140_v58, 16 }
  0xa0   :  { %vm168_vm6 = vc.u32 %v160_v62, %v164_v63  ;;  %v170_v6 = vadd.s32 %v164_v63, %v160_v62  ;;  %477 = vmatpush.msra.mxu2 %v470_v52 }
  0xa1   :  { %vm146_vm5 = vc.u32 %v138_v60, %v142_v61  ;;  %v148_v5 = vadd.s32 %v142_v61, %v138_v60  ;;  %v169_v10 = vsel %vm168_vm6, 1, %v651_v0 }
  0xa2   :  { %v147_v9 = vsel %vm146_vm5, 1, %v651_v0  ;;  %v171_v13 = vadd.s32 %v169_v10, %v163_v2  ;;  %vm172_vm8 = vc.u32 %v170_v6, %v166_v4  ;;  %v174_v30 = vadd.s32 %v170_v6, %v166_v4 }
  0xa3   :  { %v149_v11 = vadd.s32 %v147_v9, %v141_v1  ;;  %vm150_vm7 = vc.u32 %v148_v5, %v144_v3  ;;  %v173_v16 = vsel %vm172_vm8, 1, %v651_v0  ;;  %vm228_vm5 = vweird.f32 %v715_v8 }
  0xa4   :  { %v151_v15 = vsel %vm150_vm7, 1, %v651_v0  ;;  %v175_v23 = vadd.s32 %v173_v16, %v171_v13 }
  0xa5   :  { %v153_v21 = vadd.s32 %v151_v15, %v149_v11 }
  0xa6   :  { %v176_v29 = vadd.s32 %v175_v23, %v165_v22 }
  0xa7   :  { %v154_v27 = vadd.s32 %v153_v21, %v143_v18 }
  0xa8   :  { %v177_v0 = vadd.s32 %v176_v29, %v167_v28 }
  0xa9   :  { %v155_v20 = vadd.s32 %v154_v27, %v145_v26 }
  0xaa   :  { %v181_v31 = vadd.s32 1, %v177_v0 }
  0xab   :  { %vm180_vm9 = vc.u32 %v155_v20, %v174_v30  ;;  %v179_v44 = vadd.s32 %v174_v30, %v155_v20  ;;  %v469_v20 = vld [vmem:[#allocation7 + $0x68] sm:$0xff]  ;;  %v468_v30 = vld [vmem:[#allocation7 + $0x60] sm:$0xff] }
  0xac   :  { %v182_v33 = vsel %vm180_vm9, %v181_v31, %v177_v0  ;;  %478 = vmatpush.msra.mxu2 %v469_v20  ;;  %v467_v0 = vld [vmem:[#allocation7 + $0x58] sm:$0xff]  ;;  %v466_v31 = vld [vmem:[#allocation7 + $0x50] sm:$0xff] }
  0xad   :  { %v183_v34 = vadd.s32 %v182_v33, %v178_v32  ;;  %v465_v32 = vld [vmem:[#allocation7 + $0x48] sm:$0xff]  ;;  %v464_v33 = vld [vmem:[#allocation7 + $0x40] sm:$0xff] }
  0xae   :  { %479 = vmatpush.msra.mxu2 %v468_v30 }
  0xaf   :  { %v184_v35 = vadd.s32 536870912, %v183_v34 }
  0xb0   :  { %480 = vmatpush.msra.mxu2 %v467_v0 }
  0xb1   :  { %v185_v36 = vshrl.u32 %v184_v35, 30  ;;  %v461_v35 = vld [vmem:[#allocation7 + $0x28] sm:$0xff] }
  0xb2   :  { %481 = vmatpush.msra.mxu2 %v466_v31 }
  0xb3   :  { %v186_v38 = vshll.u32 %v185_v36, 30  ;;  %v209_v59 = vsub.s32 4, %v185_v36 }
  0xb4   :  { %482 = vmatpush.msra.mxu2 %v465_v32 }
  0xb5   :  { %v187_v37 = vsub.s32 %v183_v34, %v186_v38  ;;  %v210_v1 = vsel %vm87_vm12, %v209_v59, %v185_v36  ;;  %v463_v34 = vld [vmem:[#allocation7 + $0x38] sm:$0xff]  ;;  %v460_v36 = vld [vmem:[#allocation7 + $0x20] sm:$0xff] }
  0xb6   :  { %v212_v4 = vsel %vm86_vm13, 0, %v210_v1  ;;  %483 = vmatpush.msra.mxu2 %v464_v33  ;;  %v459_v38 = vld [vmem:[#allocation7 + $0x18] sm:$0xff] }
  0xb7   :  { %vm188_vm10 = vcmp.lt.s32.totalorder %v187_v37, 0  ;;  %v189_v39 = vsub.s32 0, %v187_v37  ;;  %v383_v10 = vadd.s32 3, %v212_v4  ;;  %v229_v15 = vand.u32 3, %v212_v4 }
  0xb8   :  { %484 = vmatpush.msra.mxu2 %v463_v34 }
  0xb9   :  { %v190_v40 = vsel %vm188_vm10, %v189_v39, %v187_v37  ;;  %v384_v16 = vand.u32 3, %v383_v10  ;;  %vm230_vm14 = vcmp.lt.s32.totalorder %v229_v15, 2  ;;  %vm231_vm15 = vcmp.eq.s32.totalorder %v229_v15, 0  ;;  %v457_v39 = vld [vmem:[#allocation7 + $0x8] sm:$0xff] }
  0xba   :  { %v191_v42 = vclz %v190_v40  ;;  %vm234_vm0 = vcmp.eq.s32.totalorder %v229_v15, 2  ;;  %v456_v40 = vld [vmem:[#allocation7] sm:$0xff] }
  0xbb   :  { %vm385_vm1 = vcmp.lt.s32.totalorder %v384_v16, 2  ;;  %vm386_vm2 = vcmp.eq.s32.totalorder %v384_v16, 0  ;;  %vm389_vm3 = vcmp.eq.s32.totalorder %v384_v16, 2 }
  0xbc   :  { %v516_v43 = vadd.s32 4294967294, %v191_v42  ;;  %v538_v42 = vld [vmem:[%s788_s4] ss:$0 sm:$0xff] }
  0xbe   :  { %vm517_vm11 = vcmp.lt.s32.totalorder %v516_v43, 0 }
  0xbf   :  { %v194_v19 = vsel %vm517_vm11, 0, %v516_v43 }
  0xc0   :  { %v195_v45 = vsub.s32 32, %v194_v19  ;;  %v199_v46 = vsub.s32 4294967266, %v194_v19  ;;  %v196_v47 = vshll.u32 %v187_v37, %v194_v19  ;;  %v458_v37 = vld [vmem:[#allocation7 + $0x10] sm:$0xff] }
  0xc2   :  { %v197_v48 = vshrl.u32 %v179_v44, %v195_v45  ;;  %v200_v49 = vadd.s32 127, %v199_v46 }
  0xc4   :  { %v198_v41 = vor.u32 %v197_v48, %v196_v47  ;;  %v201_v50 = vshll.u32 %v200_v49, 23 }
  0xc6   :  { %v202_v53 = vor.u32 4788187, %v201_v50  ;;  %v205_v55 = vcvt.s32.f32 %v198_v41 }
  0xc8   :  { %v203_v54 = vand.u32 2147483647, %v202_v53 }
  0xca   :  { %v206_v56 = vmul.f32 %v205_v55, %v203_v54 }
  0xcc   :  { %v207_v57 = vxor.u32 2147483648, %v206_v56 }
  0xce   :  { %v208_v58 = vsel %vm87_vm12, %v207_v57, %v206_v56 }
  0xcf   :  { %v211_v60 = vsel %vm86_vm13, %v715_v8, %v208_v58  ;;  %v462_v8 = vld [vmem:[#allocation7 + $0x30] sm:$0xff] }
  0xd0   :  { %v213_v61 = vmul.f32 %v211_v60, %v211_v60  ;;  %485 = vmatpush.msra.mxu2 %v462_v8 }
  0xd2   :  { %v214_v62 = vmul.f32 -0.001358992, %v213_v61  ;;  %v221_v63 = vmul.f32 -0.00019511016, %v213_v61  ;;  %486 = vmatpush.msra.mxu2 %v461_v35 }
  0xd4   :  { %v215_v2 = vadd.f32 0.041655596, %v214_v62  ;;  %v222_v3 = vadd.f32 0.008332121, %v221_v63  ;;  %487 = vmatpush.msra.mxu2 %v460_v36 }
  0xd6   :  { %v216_v5 = vmul.f32 %v215_v2, %v213_v61  ;;  %v223_v6 = vmul.f32 %v222_v3, %v213_v61  ;;  %488 = vmatpush.msra.mxu2 %v459_v38 }
  0xd8   :  { %v217_v7 = vadd.f32 -0.4999988, %v216_v5  ;;  %v224_v9 = vadd.f32 -0.16666654, %v223_v6  ;;  %489 = vmatpush.msra.mxu2 %v458_v37 }
  0xda   :  { %v218_v11 = vmul.f32 %v217_v7, %v213_v61  ;;  %v225_v13 = vmul.f32 %v224_v9, %v213_v61  ;;  %490 = vmatpush.msra.mxu2 %v457_v39 }
  0xdc   :  { %v219_v14 = vadd.f32 1.0, %v218_v11  ;;  %v226_v12 = vadd.f32 1.0, %v225_v13  ;;  %491 = vmatpush.msra.mxu2 %v456_v40 }
  0xde   :  { %v227_v18 = vmul.f32 %v226_v12, %v211_v60  ;;  %v235_v21 = vxor.u32 2147483648, %v219_v14 }
  0xe0   :  { %v232_v22 = vxor.u32 2147483648, %v227_v18  ;;  %v391_v24 = vsel %vm389_vm3, %v235_v21, %v227_v18  ;;  %v236_v26 = vsel %vm234_vm0, %v235_v21, %v227_v18 }
  0xe2   :  { %v388_v23 = vsel %vm386_vm2, %v219_v14, %v232_v22  ;;  %v233_v25 = vsel %vm231_vm15, %v219_v14, %v232_v22 }
  0xe3   :  { %v392_v27 = vsel %vm385_vm1, %v388_v23, %v391_v24  ;;  %v237_v28 = vsel %vm230_vm14, %v233_v25, %v236_v26 }
  0xe4   :  { %v393_v29 = vsel %vm228_vm5, nan, %v392_v27  ;;  %v238_v17 = vsel %vm228_vm5, nan, %v237_v28 }
  0xe5   :  { %521 = vmatmul.msk.f32.vlgmr.msra.gmra.mxu0 %vm398_vm4, %v393_v29  ;;  %522 = vmatmul.msk.f32.vlgmr.msra.gmra.mxu1 %vm398_vm4, %v238_v17 }
 0x162   :  { %v419_v43 = vpop.f32.mrf.mxu0  ;;  %v442_v19 = vpop.f32.mrf.mxu1 }
 0x163   :  { %v443_v44 = vadd.f32 %v442_v19, %v419_v43 }
 0x165   :  { %v449_v45 = vadd.f32 %v538_v42, %v443_v44 }
 0x167   :  { %v450_v46 = vsub.f32 0.0, %v449_v45 }
 0x169   :  { %v451_v47 = vmul.f32 1.442695, %v450_v46 }
 0x16b   :  { %540 = vpow2.f32 %v451_v47 }
 0x171   :  { %v541_v48 = vpop.eup %540 }
 0x172   :  { %v453_v49 = vadd.f32 1.0, %v541_v48 }
 0x174   :  { %542 = vrcp.f32 %v453_v49 }
 0x17a   :  { %v543_v41 = vpop.eup %542 }
 0x17b   :  { %v455_v50 = vmul.f32 %v543_v41, %v449_v45 }
 0x17d   :  { %492 = vmatmul.f32.vlgmr.msra.gmra.mxu2 %v455_v50 }
 0x200   :  { %v493_v52 = vpop.f32.mrf.mxu2 }
 0x201   :  { %v494_v53 = vadd.f32 %v539_v51, %v493_v52 }
 0x203   :  { %496 = vst [vmem:[#allocation8] sm:$0xff] %v494_v53 }
 0x204   :  { %507 = dma.vmem_to_hbm [thread:$0]  %s503_s22, 128, %s505_s24, [#allocation4]  }
 0x205   :  { %644 = dma.done.wait [#allocation4], 128  }
 0x206   :  { %645 = vsyncadd [#allocation4], 4294967168 }
 0x207   :  { %512 = vsyncpa [#allocation3], 1 }
 0x208   :  { %513 = vsyncpa [#allocation6], 1 }
 0x209   :  { %514 = vsyncpa [#allocation4], 1 }

</bundles_post_ra>
